<compile_context>
chip_gen: v7x
topology: tpu7x:2x2x1
jax: 0.10.0
libtpu: 0.0.40
codegen_flags: <defaults>
</compile_context>

<pallas_src>
import jax
import jax.numpy as jnp
from jax import lax
from jax.experimental import pallas as pl
from jax.experimental.pallas import tpu as pltpu

LN_EPS = 1e-5  # torch.nn.LayerNorm default eps


def _round_up(x, m):
    return (x + m - 1) // m * m


def _make_kernel(D, F, has_aux):
    inv_2d = 1.0 / float(2 * D)

    def kernel(*refs):
        if has_aux:
            (u_ref, p_ref, gamma_ref, beta_ref, w_ref, b_ref, aux_ref,
             out_ref, gate_ref) = refs
        else:
            (u_ref, p_ref, gamma_ref, beta_ref, w_ref, b_ref,
             out_ref, gate_ref) = refs
            aux_ref = None

        u = u_ref[...].astype(jnp.float32)       # (Tu, D); Tu == 1 when bcast
        p = p_ref[...].astype(jnp.float32)       # (Tp, D); Tp == 1 when bcast
        T = max(u.shape[0], p.shape[0])
        if u.shape[0] != T:
            u = jnp.broadcast_to(u, (T, D))      # sublane broadcast, cheap
        if p.shape[0] != T:
            p = jnp.broadcast_to(p, (T, D))

        # torch.cat([unary, pair], 1): one lane-concat keeps the LayerNorm /
        # affine / ReLU lane-dense (2D lanes) and lets the Linear be a single
        # K = 2D matmul instead of two MXU-padded K = D matmuls.
        x = jnp.concatenate([u, p], axis=1)                     # (T, 2D)

        mean = jnp.sum(x, axis=1, keepdims=True) * inv_2d       # (T, 1)
        d = x - mean
        var = jnp.sum(d * d, axis=1, keepdims=True) * inv_2d
        rstd = lax.rsqrt(var + LN_EPS)
        h = jnp.maximum(d * rstd * gamma_ref[...] + beta_ref[...], 0.0)

        # bf16 MXU matmul with f32 accumulation (weight is resident in bf16).
        logits = (jnp.dot(h.astype(jnp.bfloat16), w_ref[...],
                          preferred_element_type=jnp.float32)
                  + b_ref[...])                                 # (T, F)
        gate = jax.nn.sigmoid(logits)
        if F > 1:
            gate = jnp.mean(gate, axis=1, keepdims=True)        # (T, 1)
        if has_aux:
            # aux_ref is (T, 1) or (1, 1) (constant block when aux has 1 row).
            # TODO(synk): filter_dim == 1 together with a length-N aux would do
            # a degenerate [N,1]x[N] broadcast in PyTorch; not reproduced here.
            gate = gate * aux_ref[...].astype(jnp.float32)

        gate_ref[...] = gate
        out_ref[...] = (p * gate).astype(out_ref.dtype)         # bcast over D

    return kernel


def message_passing_unit_v1(unary_term, pair_term, params, aux_gate=None,
                            block_rows=4096):
    """JAX/Pallas equivalent of MessagePassingUnit_v1.forward."""
    unary_term = jnp.asarray(unary_term)
    pair_term = jnp.asarray(pair_term)

    nu, D = unary_term.shape
    np_, Dp = pair_term.shape
    assert D == Dp, "unary/pair feature dims must match"

    # torch .expand() broadcasting -> handled in-kernel via (1, D) blocks.
    bcast_u = (nu == 1 and np_ > 1)
    bcast_p = (nu > 1 and np_ == 1)
    N = max(nu, np_)

    w = jnp.asarray(params["w"], jnp.bfloat16)                   # (2D, F)
    F_ = w.shape[1]
    gamma = jnp.asarray(params["gamma"], jnp.float32).reshape(1, 2 * D)
    beta = jnp.asarray(params["beta"], jnp.float32).reshape(1, 2 * D)
    b = jnp.asarray(params["b"], jnp.float32).reshape(1, F_)

    # Row tiling (no padding; Pallas masks the partial trailing block):
    #   N <= 64  -> single block exactly covering the array.
    #   N  > 64  -> at least 2 grid steps (both v7x TensorCores busy), capped
    #               at block_rows rows per tile (multiple of 8) to bound VMEM.
    if N <= 64:
        TN = N
    else:
        TN = min(_round_up(block_rows, 8), _round_up(pl.cdiv(N, 2), 8))
    grid = (pl.cdiv(N, TN),)

    if bcast_u:
        u_spec = pl.BlockSpec((1, D), lambda i: (0, 0))          # stays (1, D)
    else:
        u_spec = pl.BlockSpec((TN, D), lambda i: (i, 0))
    if bcast_p:
        p_spec = pl.BlockSpec((1, D), lambda i: (0, 0))          # stays (1, D)
    else:
        p_spec = pl.BlockSpec((TN, D), lambda i: (i, 0))

    in_arrays = [unary_term, pair_term, gamma, beta, w, b]
    in_specs = [
        u_spec,
        p_spec,
        pl.BlockSpec((1, 2 * D), lambda i: (0, 0)),              # ln gamma
        pl.BlockSpec((1, 2 * D), lambda i: (0, 0)),              # ln beta
        pl.BlockSpec((2 * D, F_), lambda i: (0, 0)),             # linear weight
        pl.BlockSpec((1, F_), lambda i: (0, 0)),                 # linear bias
    ]

    has_aux = aux_gate is not None
    if has_aux:
        aux = jnp.asarray(aux_gate, jnp.float32).reshape(-1, 1)
        if aux.shape[0] == 1 and N > 1:
            # Single-row aux: constant (1, 1) block, no N-row HBM broadcast.
            in_specs.append(pl.BlockSpec((1, 1), lambda i: (0, 0)))
        else:
            assert aux.shape[0] == N, "aux_gate rows must be 1 or N"
            in_specs.append(pl.BlockSpec((TN, 1), lambda i: (i, 0)))
        in_arrays.append(aux)

    out, gate = pl.pallas_call(
        _make_kernel(D, F_, has_aux),
        out_shape=(jax.ShapeDtypeStruct((N, D), pair_term.dtype),
                   jax.ShapeDtypeStruct((N, 1), jnp.float32)),
        grid=grid,
        in_specs=in_specs,
        out_specs=(pl.BlockSpec((TN, D), lambda i: (i, 0)),
                   pl.BlockSpec((TN, 1), lambda i: (i, 0))),
        compiler_params=pltpu.CompilerParams(
            dimension_semantics=("parallel",)),
    )(*in_arrays)

    # torch: mean(1) squeezes to [N] when filter_dim > 1, else gate stays [N,1].
    gate = gate[:, 0] if F_ > 1 else gate
    return out, gate


def _reference(unary, pair, params, aux_gate=None):
    """Pure-JAX (f32) reference mirroring the PyTorch forward."""
    unary = jnp.asarray(unary, jnp.float32)
    pair = jnp.asarray(pair, jnp.float32)
    if unary.shape[0] == 1 and pair.shape[0] > 1:
        unary = jnp.broadcast_to(unary, (pair.shape[0], unary.shape[1]))
    if unary.shape[0] > 1 and pair.shape[0] == 1:
        pair = jnp.broadcast_to(pair, (unary.shape[0], pair.shape[1]))
    x = jnp.concatenate([unary, pair], axis=1)
    mean = jnp.mean(x, axis=1, keepdims=True)
    var = jnp.mean((x - mean) ** 2, axis=1, keepdims=True)
    xn = (x - mean) / jnp.sqrt(var + LN_EPS)
    xn = xn * params["gamma"][None, :] + params["beta"][None, :]
    h = jnp.maximum(xn, 0.0)
    gate = jax.nn.sigmoid(h @ params["w"] + params["b"][None, :])
    if gate.shape[1] > 1:
        gate = jnp.mean(gate, axis=1)
    if aux_gate is not None:
        gate = gate * jnp.asarray(aux_gate, jnp.float32).reshape(-1)
    out = pair * gate.reshape(-1, 1)
    return out, gate


if __name__ == "__main__":
    input_dim = 32      # D
    filter_dim = 64     # F

    key = jax.random.PRNGKey(0)
    ks = jax.random.split(key, 12)

    params = {
        "gamma": 1.0 + 0.1 * jax.random.normal(ks[0], (2 * input_dim,), jnp.float32),
        "beta": 0.05 * jax.random.normal(ks[1], (2 * input_dim,), jnp.float32),
        "w": 0.05 * jax.random.normal(ks[2], (2 * input_dim, filter_dim), jnp.float32),
        "b": 0.05 * jax.random.normal(ks[3], (filter_dim,), jnp.float32),
    }
    # TODO(synk): gate_weight / aux_gate_weight are declared in __init__ but
    # have no effect on forward(); intentionally not part of the kernel.

    def check(unary, pair, aux, tag, atol=5e-3, rtol=2e-2):
        out, gate = message_passing_unit_v1(unary, pair, params, aux_gate=aux)
        jax.block_until_ready((out, gate))
        out_r, gate_r = _reference(unary, pair, params, aux_gate=aux)
        assert out.shape == out_r.shape and gate.shape == gate_r.shape, tag
        assert jnp.allclose(jnp.asarray(out, jnp.float32), out_r,
                            atol=atol, rtol=rtol), tag
        assert jnp.allclose(gate, gate_r, atol=atol, rtol=rtol), tag

    # 1) small case (original toy shapes), no aux gate
    N1 = 8
    u1 = jax.random.normal(ks[4], (N1, input_dim), jnp.float32)
    p1 = jax.random.normal(ks[5], (N1, input_dim), jnp.float32)
    check(u1, p1, None, "base")

    # 2) broadcast path: single-row unary against many pair rows, with aux gate
    p2 = jax.random.normal(ks[6], (16, input_dim), jnp.float32)
    u2 = jax.random.normal(ks[7], (1, input_dim), jnp.float32)
    aux2 = jax.nn.sigmoid(jax.random.normal(ks[8], (16,), jnp.float32))
    check(u2, p2, aux2, "broadcast+aux")

    # 3) reverse broadcast (single pair row) + single-row aux (constant block)
    u3 = jax.random.normal(ks[9], (24, input_dim), jnp.float32)
    p3 = jax.random.normal(ks[10], (1, input_dim), jnp.float32)
    aux3 = jnp.asarray([0.7], jnp.float32)
    check(u3, p3, aux3, "bcast_pair+scalar_aux")

    # 4) tiled path with a partial trailing block (grid of 2, no padding)
    N4 = 1234
    u4 = jax.random.normal(ks[11], (N4, input_dim), jnp.float32)
    p4 = jax.random.normal(ks[4], (N4, input_dim), jnp.float32)
    check(u4, p4, None, "tiled_partial")

    # 5) bf16 I/O path (kernel upcasts internally; looser tolerance for bf16
    #    input/output quantization)
    N5 = 300
    u5 = jax.random.normal(ks[5], (N5, input_dim), jnp.float32).astype(jnp.bfloat16)
    p5 = jax.random.normal(ks[6], (N5, input_dim), jnp.float32).astype(jnp.bfloat16)
    check(u5, p5, None, "bf16_io", atol=3e-2, rtol=5e-2)

    print("KERNEL_OK")
</pallas_src>

<mosaic_0001>
module attributes {stable_mosaic.version = 11 : i64} {
  func.func @kernel(%arg0: i32, %arg1: memref<8x32xf32, #tpu.memory_space<vmem>>, %arg2: memref<8x32xf32, #tpu.memory_space<vmem>>, %arg3: memref<1x64xf32, #tpu.memory_space<vmem>>, %arg4: memref<1x64xf32, #tpu.memory_space<vmem>>, %arg5: memref<64x64xbf16, #tpu.memory_space<vmem>>, %arg6: memref<1x64xf32, #tpu.memory_space<vmem>>, %arg7: memref<8x32xf32, #tpu.memory_space<vmem>>, %arg8: memref<8x1xf32, #tpu.memory_space<vmem>>) attributes {dimension_semantics = [#tpu.dimension_semantics<parallel>], iteration_bounds = array<i64: 1>, scalar_prefetch = 0 : i64, scratch_operands = 0 : i64, tpu.core_type = #tpu.core_type<tc>, window_params = [{transform_indices = @transform_0, window_bounds = array<i64: 8, 32>}, {transform_indices = @transform_1, window_bounds = array<i64: 8, 32>}, {pipeline_mode = #tpu.pipeline_mode<synchronous>, transform_indices = @transform_2, window_bounds = array<i64: 1, 64>}, {pipeline_mode = #tpu.pipeline_mode<synchronous>, transform_indices = @transform_3, window_bounds = array<i64: 1, 64>}, {pipeline_mode = #tpu.pipeline_mode<synchronous>, transform_indices = @transform_4, window_bounds = array<i64: 64, 64>}, {pipeline_mode = #tpu.pipeline_mode<synchronous>, transform_indices = @transform_5, window_bounds = array<i64: 1, 64>}, {transform_indices = @transform_6, window_bounds = array<i64: 8, 32>}, {transform_indices = @transform_7, window_bounds = array<i64: 8, 1>}]} {
    %c0 = arith.constant 0 : index
    %c0_0 = arith.constant 0 : index
    %0 = vector.load %arg1[%c0, %c0_0] : memref<8x32xf32, #tpu.memory_space<vmem>>, vector<8x32xf32>
    %c0_1 = arith.constant 0 : index
    %c0_2 = arith.constant 0 : index
    %1 = vector.load %arg2[%c0_1, %c0_2] : memref<8x32xf32, #tpu.memory_space<vmem>>, vector<8x32xf32>
    %2 = tpu.concatenate %0, %1 in 1 : vector<8x32xf32>, vector<8x32xf32> -> vector<8x64xf32>
    %cst = arith.constant dense<0.000000e+00> : vector<8xf32>
    %3 = vector.multi_reduction <add>, %2, %cst [1] : vector<8x64xf32> to vector<8xf32>
    %4 = vector.shape_cast %3 : vector<8xf32> to vector<8x1xf32>
    %cst_3 = arith.constant 1.562500e-02 : f32
    %5 = vector.broadcast %cst_3 : f32 to vector<8x1xf32>
    %6 = arith.mulf %4, %5 : vector<8x1xf32>
    %7 = vector.broadcast %6 : vector<8x1xf32> to vector<8x64xf32>
    %8 = arith.subf %2, %7 : vector<8x64xf32>
    %9 = arith.mulf %8, %8 : vector<8x64xf32>
    %cst_4 = arith.constant dense<0.000000e+00> : vector<8xf32>
    %10 = vector.multi_reduction <add>, %9, %cst_4 [1] : vector<8x64xf32> to vector<8xf32>
    %11 = vector.shape_cast %10 : vector<8xf32> to vector<8x1xf32>
    %cst_5 = arith.constant 1.562500e-02 : f32
    %12 = vector.broadcast %cst_5 : f32 to vector<8x1xf32>
    %13 = arith.mulf %11, %12 : vector<8x1xf32>
    %cst_6 = arith.constant 9.99999974E-6 : f32
    %14 = vector.broadcast %cst_6 : f32 to vector<8x1xf32>
    %15 = arith.addf %13, %14 : vector<8x1xf32>
    %16 = math.rsqrt %15 : vector<8x1xf32>
    %17 = vector.broadcast %16 : vector<8x1xf32> to vector<8x64xf32>
    %18 = arith.mulf %8, %17 : vector<8x64xf32>
    %c0_7 = arith.constant 0 : index
    %c0_8 = arith.constant 0 : index
    %19 = vector.load %arg3[%c0_7, %c0_8] : memref<1x64xf32, #tpu.memory_space<vmem>>, vector<1x64xf32>
    %20 = vector.broadcast %19 : vector<1x64xf32> to vector<8x64xf32>
    %21 = arith.mulf %18, %20 : vector<8x64xf32>
    %c0_9 = arith.constant 0 : index
    %c0_10 = arith.constant 0 : index
    %22 = vector.load %arg4[%c0_9, %c0_10] : memref<1x64xf32, #tpu.memory_space<vmem>>, vector<1x64xf32>
    %23 = vector.broadcast %22 : vector<1x64xf32> to vector<8x64xf32>
    %24 = arith.addf %21, %23 : vector<8x64xf32>
    %cst_11 = arith.constant 0.000000e+00 : f32
    %25 = vector.broadcast %cst_11 : f32 to vector<8x64xf32>
    %26 = arith.maximumf %24, %25 : vector<8x64xf32>
    %27 = arith.truncf %26 : vector<8x64xf32> to vector<8x64xbf16>
    %c0_12 = arith.constant 0 : index
    %c0_13 = arith.constant 0 : index
    %28 = vector.load %arg5[%c0_12, %c0_13] : memref<64x64xbf16, #tpu.memory_space<vmem>>, vector<64x64xbf16>
    %cst_14 = arith.constant dense<0.000000e+00> : vector<8x64xf32>
    %29 = tpu.matmul %27, %28, %cst_14 {dimension_numbers = #tpu.dot_dimension_numbers<[1], [0], [0], [1], [0, 0, 1, 1], [], []>} : vector<8x64xbf16>, vector<64x64xbf16>, vector<8x64xf32> -> vector<8x64xf32>
    %c0_15 = arith.constant 0 : index
    %c0_16 = arith.constant 0 : index
    %30 = vector.load %arg6[%c0_15, %c0_16] : memref<1x64xf32, #tpu.memory_space<vmem>>, vector<1x64xf32>
    %31 = vector.broadcast %30 : vector<1x64xf32> to vector<8x64xf32>
    %32 = arith.addf %29, %31 : vector<8x64xf32>
    %33 = arith.negf %32 : vector<8x64xf32>
    %34 = math.exp %33 : vector<8x64xf32>
    %cst_17 = arith.constant 1.000000e+00 : f32
    %35 = vector.broadcast %cst_17 : f32 to vector<8x64xf32>
    %36 = arith.addf %35, %34 : vector<8x64xf32>
    %37 = arith.divf %35, %36 : vector<8x64xf32>
    %cst_18 = arith.constant dense<0.000000e+00> : vector<8xf32>
    %38 = vector.multi_reduction <add>, %37, %cst_18 [1] : vector<8x64xf32> to vector<8xf32>
    %39 = vector.shape_cast %38 : vector<8xf32> to vector<8x1xf32>
    %cst_19 = arith.constant 6.400000e+01 : f32
    %40 = vector.broadcast %cst_19 : f32 to vector<8x1xf32>
    %41 = arith.divf %39, %40 : vector<8x1xf32>
    %c0_20 = arith.constant 0 : index
    %c0_21 = arith.constant 0 : index
    %42 = vector.load %arg8[%c0_20, %c0_21] : memref<8x1xf32, #tpu.memory_space<vmem>>, vector<8x1xf32>
    tpu.vector_store %arg8[%c0_20, %c0_21], %41 {strides = array<i32>} : memref<8x1xf32, #tpu.memory_space<vmem>>, vector<8x1xf32>,
    %43 = vector.broadcast %41 : vector<8x1xf32> to vector<8x32xf32>
    %44 = arith.mulf %1, %43 : vector<8x32xf32>
    %c0_22 = arith.constant 0 : index
    %c0_23 = arith.constant 0 : index
    %45 = vector.load %arg7[%c0_22, %c0_23] : memref<8x32xf32, #tpu.memory_space<vmem>>, vector<8x32xf32>
    tpu.vector_store %arg7[%c0_22, %c0_23], %44 {strides = array<i32>} : memref<8x32xf32, #tpu.memory_space<vmem>>, vector<8x32xf32>,
    return
  }
  func.func @transform_0(%arg0: i32) -> (i32, i32) {
    %c0_i32 = arith.constant 0 : i32
    %c0_i32_0 = arith.constant 0 : i32
    return %arg0, %c0_i32 : i32, i32
  }
  func.func @transform_1(%arg0: i32) -> (i32, i32) {
    %c0_i32 = arith.constant 0 : i32
    %c0_i32_0 = arith.constant 0 : i32
    return %arg0, %c0_i32 : i32, i32
  }
  func.func @transform_2(%arg0: i32) -> (i32, i32) {
    %c0_i32 = arith.constant 0 : i32
    %c0_i32_0 = arith.constant 0 : i32
    %c0_i32_1 = arith.constant 0 : i32
    return %c0_i32, %c0_i32_0 : i32, i32
  }
  func.func @transform_3(%arg0: i32) -> (i32, i32) {
    %c0_i32 = arith.constant 0 : i32
    %c0_i32_0 = arith.constant 0 : i32
    %c0_i32_1 = arith.constant 0 : i32
    return %c0_i32, %c0_i32_0 : i32, i32
  }
  func.func @transform_4(%arg0: i32) -> (i32, i32) {
    %c0_i32 = arith.constant 0 : i32
    %c0_i32_0 = arith.constant 0 : i32
    %c0_i32_1 = arith.constant 0 : i32
    return %c0_i32, %c0_i32_0 : i32, i32
  }
  func.func @transform_5(%arg0: i32) -> (i32, i32) {
    %c0_i32 = arith.constant 0 : i32
    %c0_i32_0 = arith.constant 0 : i32
    %c0_i32_1 = arith.constant 0 : i32
    return %c0_i32, %c0_i32_0 : i32, i32
  }
  func.func @transform_6(%arg0: i32) -> (i32, i32) {
    %c0_i32 = arith.constant 0 : i32
    %c0_i32_0 = arith.constant 0 : i32
    return %arg0, %c0_i32 : i32, i32
  }
  func.func @transform_7(%arg0: i32) -> (i32, i32) {
    %c0_i32 = arith.constant 0 : i32
    %c0_i32_0 = arith.constant 0 : i32
    return %arg0, %c0_i32 : i32, i32
  }
}

</mosaic_0001>

<bundles_post_ra>
// kernel: tpu_custom_call.1
= control target key start
LH: loop header
LB: loop body
LE: loop exit
PB: predicated region body
PF: predicated region fallthrough
CT: control target
= control target key end

     0   :  { %13 = vsyncpa [#allocation3], 0  ;;  %s479_s0 = inlined_call_operand.hbm [shape: f32[8,32], index: 0, kind: input, shape index: {}]   ;;  %s480_s1 = inlined_call_operand.hbm [shape: f32[8,32], index: 1, kind: input, shape index: {}]   ;;  %s481_s2 = inlined_call_operand.vmem [shape: f32[1,64], index: 2, kind: input, shape index: {}]   ;;  %s482_s3 = inlined_call_operand.vmem [shape: f32[1,64], index: 3, kind: input, shape index: {}]   ;;  %s483_s4 = inlined_call_operand.hbm [shape: bf16[64,64], index: 4, kind: input, shape index: {}]   ;;  %s484_s5 = inlined_call_operand.vmem [shape: f32[1,64], index: 5, kind: input, shape index: {}]   ;;  %s485_s6 = inlined_call_operand.hbm [shape: f32[8,32], index: 6, kind: output, shape index: {0}]   ;;  %s486_s7 = inlined_call_operand.vmem [shape: f32[8,1], index: 7, kind: output, shape index: {1}]  }
   0x1   :  { %14 = vsyncpa [#allocation6], 0 }
   0x2   :  { %15 = vsyncpa [#allocation4], 0  ;;  %s360_s24 = smov [#allocation5]   ;;  %s361_s26 = smov [#allocation2]  }
   0x3   :  { %s32_s25 = sshll.u32 %s360_s24, 4  ;;  %s22_s27 = sshll.u32 %s361_s26, 4  ;;  %s33_s25 = int_to_ptr.vmem [resolvable:$true] %s32_s25  ;;  %s23_s27 = int_to_ptr.vmem [resolvable:$true] %s22_s27 }
   0x4   :  { %s266_s30 = scalar_lea.hbm %s480_s1, 128 }
   0x5   :  { %p267_p0 = scmp.ne.s32.totalorder %s480_s1, %s266_s30  ;;  %p270_p1 = scmp.lt.u32.totalorder %s266_s30, %s480_s1 }
   0x7   :  { %p272_p2 = pnand %p270_p1, %p267_p0 }
   0x9   :  { %275 = shalt.err (!%p272_p2)
}
   0xa   :  { %s276_s12 = scalar_lea.vmem %s33_s25, 128  ;;  %p281_p4 = scmp.lt.s32.totalorder %s33_s25, %s33_s25 }
   0xb   :  { %p277_p3 = scmp.ne.s32.totalorder %s33_s25, %s276_s12  ;;  %p282_p5 = scmp.lt.s32.totalorder %s276_s12, %s276_s12 }
   0xd   :  { %p283_p6 = por %p282_p5, %p281_p4 }
   0xf   :  { %p284_p7 = pnand %p283_p6, %p277_p3 }
  0x11   :  { %287 = shalt.err (!%p284_p7)
}
  0x12   :  { %35 = dma.hbm_to_vmem [thread:$0]  %s480_s1, 128, %s33_s25, [#allocation6]  }
  0x13   :  { %s288_s17 = scalar_lea.hbm %s479_s0, 128 }
  0x14   :  { %p289_p8 = scmp.ne.s32.totalorder %s479_s0, %s288_s17  ;;  %p292_p9 = scmp.lt.u32.totalorder %s288_s17, %s479_s0 }
  0x16   :  { %p294_p10 = pnand %p292_p9, %p289_p8 }
  0x18   :  { %297 = shalt.err (!%p294_p10)
}
  0x19   :  { %s298_s22 = scalar_lea.vmem %s23_s27, 128  ;;  %p303_p12 = scmp.lt.s32.totalorder %s23_s27, %s23_s27 }
  0x1a   :  { %p299_p11 = scmp.ne.s32.totalorder %s23_s27, %s298_s22  ;;  %p304_p13 = scmp.lt.s32.totalorder %s298_s22, %s298_s22 }
  0x1c   :  { %p305_p0 = por %p304_p13, %p303_p12 }
  0x1e   :  { %p306_p1 = pnand %p305_p0, %p299_p11 }
  0x20   :  { %309 = shalt.err (!%p306_p1)
}
  0x21   :  { %25 = dma.hbm_to_vmem [thread:$0]  %s479_s0, 128, %s23_s27, [#allocation3]  }
  0x22   :  { %s362_s24 = smov [#allocation7]   ;;  %s310_s29 = scalar_lea.hbm %s483_s4, 512 }
  0x23   :  { %s45_s25 = sshll.u32 %s362_s24, 4  ;;  %p311_p2 = scmp.ne.s32.totalorder %s483_s4, %s310_s29  ;;  %s46_s25 = int_to_ptr.vmem [resolvable:$true] %s45_s25 }
  0x24   :  { %p314_p3 = scmp.lt.u32.totalorder %s310_s29, %s483_s4 }
  0x26   :  { %p316_p4 = pnand %p314_p3, %p311_p2 }
  0x28   :  { %319 = shalt.err (!%p316_p4)
}
  0x29   :  { %s320_s11 = scalar_lea.vmem %s46_s25, 512  ;;  %p325_p6 = scmp.lt.s32.totalorder %s46_s25, %s46_s25 }
  0x2a   :  { %p321_p5 = scmp.ne.s32.totalorder %s46_s25, %s320_s11  ;;  %p326_p7 = scmp.lt.s32.totalorder %s320_s11, %s320_s11 }
  0x2c   :  { %p327_p8 = por %p326_p7, %p325_p6 }
  0x2e   :  { %p328_p9 = pnand %p327_p8, %p321_p5 }
  0x30   :  { %331 = shalt.err (!%p328_p9)
}
  0x31   :  { %s363_s0 = smov 64   ;;  %s364_s27 = smov 4  }
  0x32   :  { %51 = dma.hbm_to_vmem [thread:$0]  %s483_s4, 512, %s46_s25, [#allocation6], %s363_s0, %s363_s0, %s364_s27  }
  0x33   :  { %354 = dma.done.wait [#allocation3], 128  }
  0x34   :  { %355 = vsyncadd [#allocation3], 4294967168 }
  0x35   :  { %356 = dma.done.wait [#allocation6], 640  }
  0x36   :  { %357 = vsyncadd [#allocation6], 4294966656  ;;  %v445_v0 = vld [vmem:[#allocation5] sm:$0xff]  ;;  %s365_s14 = smov 32   ;;  %v64_v1 = vld [vmem:[#allocation2] sm:$0xff]  ;;  %vm70_vm0 = vcmask 261120  }
  0x37   :  { %67 = vrot.lane.b32.xlu0 %v445_v0, %s365_s14  ;;  %vm72_vm1 = vcmask 523264   ;;  %v256_v10 = vld [vmem:[#allocation7] sm:$0xff]   ;;  %v366_v11 = vmov 0.0   ;;  %vm367_vm2 = vmmov 0   ;;  %v257_v12 = vld [vmem:[#allocation7 + $0x8] sm:$0xff]   ;;  %v258_v13 = vld [vmem:[#allocation7 + $0x10] sm:$0xff]  }
  0x38   :  { %235 = vmatprep.subr.bf16.mxu0 %v366_v11  ;;  %243 = vmatprep.mubr.msk.bf16.mxu0 %vm367_vm2, %v366_v11  ;;  %v259_v14 = vld [vmem:[#allocation7 + $0x18] sm:$0xff]   ;;  %v221_v19 = vld [vmem:[%s481_s2] ss:$0 sm:$0xff]  ;;  %vm197_vm3 = vcmask 7168   ;;  %s368_s2 = smov [#allocation8]  }
  0x39   :  { %236 = vmatpush3.bf16.msra.mxu0 %v256_v10  ;;  %v222_v21 = vld [vmem:[%s482_s3] ss:$0 sm:$0xff]  ;;  %s207_s3 = sshll.u32 %s368_s2, 4  ;;  %s208_s3 = int_to_ptr.vmem [resolvable:$true] %s207_s3 }
  0x3a   :  { %237 = vmatprep.subr.bf16.mxu0 %v366_v11  ;;  %v223_v26 = vld [vmem:[%s484_s5] ss:$0 sm:$0xff]  ;;  %s332_s21 = scalar_lea.vmem %s208_s3, 128  ;;  %p337_p11 = scmp.lt.s32.totalorder %s208_s3, %s208_s3 }
  0x3b   :  { %p333_p10 = scmp.ne.s32.totalorder %s208_s3, %s332_s21  ;;  %p338_p12 = scmp.lt.s32.totalorder %s332_s21, %s332_s21 }
  0x3d   :  { %238 = vmatpush3.bf16.msra.mxu0 %v257_v12  ;;  %p339_p13 = por %p338_p12, %p337_p11 }
  0x3e   :  { %239 = vmatprep.subr.bf16.mxu0 %v366_v11 }
  0x3f   :  { %p340_p0 = pnand %p339_p13, %p333_p10 }
  0x41   :  { %240 = vmatpush3.bf16.msra.mxu0 %v258_v13 }
  0x42   :  { %241 = vmatprep.subr.bf16.mxu0 %v366_v11 }
  0x45   :  { %242 = vmatpush3.bf16.msra.mxu0 %v259_v14 }
  0xa9   :  { %v68_v2 = vpop.permute.xlu0 %67 }
  0xaa   :  { %v71_v3 = vsel %vm70_vm0, %v64_v1, %v68_v2 }
  0xab   :  { %v73_v4 = vsel %vm72_vm1, %v71_v3, 0.0 }
  0xac   :  { %74 = vadd.xlane.f32.xlu0 %v73_v4 }
 0x139   :  { %v75_v5 = vpop.xlane.xlu0 %74 }
 0x13a   :  { %v76_v6 = vmul.f32 0.015625, %v75_v5 }
 0x13c   :  { %v77_v7 = vsub.f32 %v71_v3, %v76_v6 }
 0x13e   :  { %v78_v8 = vmul.f32 %v77_v7, %v77_v7 }
 0x140   :  { %v79_v9 = vsel %vm72_vm1, %v78_v8, 0.0 }
 0x141   :  { %80 = vadd.xlane.f32.xlu1 %v79_v9 }
 0x1ce   :  { %v81_v15 = vpop.xlane.xlu1 %80 }
 0x1cf   :  { %v82_v16 = vmul.f32 0.015625, %v81_v15 }
 0x1d1   :  { %v83_v17 = vadd.f32 1e-05, %v82_v16 }
 0x1d3   :  { %260 = vrsqrt.f32 %v83_v17 }
 0x1dd   :  { %v261_v18 = vpop.eup %260 }
 0x1de   :  { %v85_v20 = vmul.f32 %v261_v18, %v77_v7 }
 0x1e0   :  { %v93_v22 = vmul.f32 %v221_v19, %v85_v20 }
 0x1e2   :  { %v101_v23 = vadd.f32 %v222_v21, %v93_v22 }
 0x1e4   :  { %v102_v24 = vmax.f32 %v101_v23, 0.0 }
 0x1e6   :  { %v103_v25 = vpack.c.bf16 %v102_v24, %v102_v24 }
 0x1e8   :  { %244 = vmatmul.mubr.msk.bf16.vlgmr.msra.gmra.mrb[0].mxu0 %vm72_vm1, %v103_v25 }
 0x2bb   :  { %v180_v27 = vpop.f32.mrb[0].mxu0 }
 0x2bc   :  { %v181_v28 = vadd.f32 %v223_v26, %v180_v27  ;;  %v245_v29 = vpop.f32.mrb[1].mxu0 }
 0x2bd   :  { %v183_v30 = vpop.f32.mrb[2].mxu0 }
 0x2be   :  { %v229_v31 = vmul.f32 -1.442695, %v181_v28  ;;  %v246_v32 = vpop.f32.mrb[3].mxu0 }
 0x2c0   :  { %262 = vpow2.f32 %v229_v31 }
 0x2ca   :  { %v263_v33 = vpop.eup %262 }
 0x2cb   :  { %v189_v34 = vadd.f32 1.0, %v263_v33 }
 0x2cd   :  { %264 = vrcp.f32 %v189_v34 }
 0x2d7   :  { %v265_v35 = vpop.eup %264 }
 0x2d8   :  { %v192_v36 = vsel %vm72_vm1, %v265_v35, 0.0 }
 0x2d9   :  { %193 = vadd.xlane.f32.xlu1 %v192_v36 }
 0x366   :  { %v194_v37 = vpop.xlane.xlu1 %193 }
 0x367   :  { %v196_v38 = vmul.f32 0.015625, %v194_v37 }
 0x369   :  { %198 = vst.msk [vmem:[%s486_s7] sm:$0xff] %vm197_vm3, %v196_v38  ;;  %v199_v39 = vmul.f32 %v196_v38, %v445_v0 }
 0x36b   :  { %200 = vst.msk [vmem:[#allocation8] sm:$0xff] %vm70_vm0, %v199_v39 }
 0x36c   :  { %343 = shalt.err (!%p340_p0)
}
 0x36d   :  { %s344_s23 = scalar_lea.hbm %s485_s6, 128 }
 0x36e   :  { %p345_p1 = scmp.ne.s32.totalorder %s485_s6, %s344_s23  ;;  %p348_p2 = scmp.lt.u32.totalorder %s344_s23, %s485_s6 }
 0x370   :  { %p350_p3 = pnand %p348_p2, %p345_p1 }
 0x372   :  { %353 = shalt.err (!%p350_p3)
}
 0x373   :  { %210 = dma.vmem_to_hbm [thread:$0]  %s208_s3, 128, %s485_s6, [#allocation4]  }
 0x374   :  { %358 = dma.done.wait [#allocation4], 128  }
 0x375   :  { %359 = vsyncadd [#allocation4], 4294967168 }
 0x376   :  { %218 = vsyncpa [#allocation3], 1 }
 0x377   :  { %219 = vsyncpa [#allocation6], 1 }
 0x378   :  { %220 = vsyncpa [#allocation4], 1 }

</bundles_post_ra>
